<compile_context>
chip_gen: v7x
topology: tpu7x:2x2x1
jax: 0.10.0
libtpu: 0.0.40
codegen_flags: <defaults>
</compile_context>

<pallas_src>
import functools
import math

import numpy as np
import jax
import jax.numpy as jnp
from jax import lax
from jax.experimental import pallas as pl
from jax.experimental.pallas import tpu as pltpu


def _pick_tile(n, candidates=(2048, 1024, 512, 256, 128)):
    """Largest lane tile (multiple of 128) dividing n, else the full extent."""
    for c in candidates:
        if n % c == 0:
            return c
    return n


# ----------------------------------------------------------------------------
# Kernel 1: argmax over the class axis.  Input transposed to (B, C, V) so the
# large V axis is lane-dense and the small class axis C is reduced over
# sublanes; output (1, V) int32 is a dense lane store.
# softmax(-1).argmax(-1) == argmax(-1).
# ----------------------------------------------------------------------------
def _argmax_kernel(x_ref, o_ref, *, num_c):
    x = x_ref[0]                                           # (C, tv) f32
    m = jnp.max(x, axis=0, keepdims=True)                  # (1, tv)
    iot = lax.broadcasted_iota(jnp.int32, x.shape, 0)      # (C, tv)
    idx = jnp.min(jnp.where(x == m, iot, num_c), axis=0, keepdims=True)
    o_ref[0] = idx.astype(jnp.int32)                       # (1, tv)


# ----------------------------------------------------------------------------
# Kernel 2 (hot path): frustum -> ego -> occupancy-grid linear voxel index.
# One grid point per (batch, view, HW-tile).  The frustum (u+0.5, v+0.5, depth)
# is generated in-kernel via iotas (no per-point inputs).  Per-view scalars are
# pre-composed in the wrapper and read from a flat f32 SMEM array, 21 per view:
#   [0:3)  a0 = (post_rot_inv @ diag(ds,ds,1))[:,0]
#   [3:6)  a1 = (post_rot_inv @ diag(ds,ds,1))[:,1]
#   [6:9)  b1 = (post_rot_inv @ diag(ds,ds,1))[:,2] - post_rot_inv @ post_trans
#   [9:18) M2 = diag(ratio) @ cam2ego_rot @ inv(cam2img)   (row-major)
#   [18:21) t2 = ratio * cam2ego_trans - xyz_min
# Output: int32 linear voxel index, -1 where the point falls outside the grid.
# ----------------------------------------------------------------------------
def _frustum_kernel(cams_ref, lin_ref, *, num_views, tile_hw, img_w,
                    d_start, d_step, ext, dims):
    b = pl.program_id(0)
    n = pl.program_id(1)
    j = pl.program_id(2)
    base = (b * num_views + n) * 21

    def sc(off):
        return cams_ref[base + off]

    depth_n = lin_ref.shape[2]                             # D (static block dim)
    shape = (depth_n, tile_hw)

    # in-kernel frustum generation (lane axis = flattened H*W pixel index)
    hw = (lax.broadcasted_iota(jnp.int32, shape, 1) + j * tile_hw).astype(jnp.float32)
    dd = lax.broadcasted_iota(jnp.int32, shape, 0).astype(jnp.float32)
    vr = jnp.floor((hw + 0.5) / float(img_w))              # pixel row index
    uc = hw - vr * float(img_w)                            # pixel col index
    uu = uc + 0.5
    vv = vr + 0.5
    depth = d_start + d_step * dd

    # q = post_rot_inv @ (pix * [ds,ds,1] - post_trans)     (pre-composed)
    q = [sc(r) * uu + sc(3 + r) * vv + sc(6 + r) for r in range(3)]
    # p = q * depth ; g = M2 @ p + t2  (grid coords already shifted by -xyz_min)
    p = [qr * depth for qr in q]
    g = [sc(9 + 3 * r) * p[0] + sc(10 + 3 * r) * p[1] + sc(11 + 3 * r) * p[2]
         + sc(18 + r) for r in range(3)]

    valid = ((g[0] >= 0.0) & (g[0] <= ext[0]) &
             (g[1] >= 0.0) & (g[1] <= ext[1]) &
             (g[2] >= 0.0) & (g[2] <= ext[2]))

    ix = jnp.clip(jnp.floor(g[0]), 0.0, float(dims[0] - 1)).astype(jnp.int32)
    iy = jnp.clip(jnp.floor(g[1]), 0.0, float(dims[1] - 1)).astype(jnp.int32)
    iz = jnp.clip(jnp.floor(g[2]), 0.0, float(dims[2] - 1)).astype(jnp.int32)
    lin = (ix * dims[1] + iy) * dims[2] + iz
    lin_ref[0, 0] = jnp.where(valid, lin, -1)              # (D, tile_hw) i32


# ----------------------------------------------------------------------------
# Kernel 3: "first non-ignore along depth" + pseudo depth map, in the (D, HW)
# layout (reduce over the D sublane axis, lane-dense (1, HW) outputs).
# ----------------------------------------------------------------------------
def _render_kernel(sem_ref, out_sem_ref, out_dep_ref, *, d_start, d_step, ignore):
    sem = sem_ref[0, 0]                                    # (D, thw) i32 (ignore already filled)
    num_d = sem.shape[0]
    nonign = sem != ignore
    iot = lax.broadcasted_iota(jnp.int32, sem.shape, 0)
    first = jnp.min(jnp.where(nonign, iot, num_d), axis=0, keepdims=True)   # (1, thw)
    first = jnp.where(first < num_d, first, 0)             # argmax(all-False) == 0
    sel = iot == first
    val = jnp.sum(jnp.where(sel, sem, 0), axis=0, keepdims=True)            # depth gather
    out_sem_ref[0, 0] = val
    out_dep_ref[0, 0] = d_start + d_step * first.astype(jnp.float32)


# ----------------------------------------------------------------------------
# Kernel 4: cross-entropy with one-hot-logit predictions, ignore_index target.
#   CE(one_hot(pred), tgt) = log((C-1) + e) - [tgt == pred]
# ----------------------------------------------------------------------------
def _ce_kernel(pred_ref, tgt_ref, loss_ref, *, num_class, ignore):
    pred = pred_ref[...]                                   # (R, 128) i32
    tgt = tgt_ref[...]
    lse = float(math.log((num_class - 1) + math.e))
    match = (tgt == pred).astype(jnp.float32)
    valid = tgt != ignore
    li = jnp.where(valid, lse - match, 0.0)
    cnt = jnp.where(valid, 1.0, 0.0)
    s = jnp.sum(jnp.sum(li, axis=1, keepdims=True), axis=0, keepdims=True)   # (1,1)
    c = jnp.sum(jnp.sum(cnt, axis=1, keepdims=True), axis=0, keepdims=True)  # (1,1)
    loss_ref[...] = s / jnp.maximum(c, 1.0)


# ----------------------------------------------------------------------------
# Wrapper module
# ----------------------------------------------------------------------------
class PesudoRenderNetPallas:
    def __init__(self, num_cams=1, batch_size=1, downsample=1, grid_config=None,
                 input_size=None, grid_size=(0.4, 0.4, 0.4), num_class=1):
        self.batch_size = batch_size
        self.num_cams = num_cams
        self.num_class = num_class
        self.downsample = downsample
        self.ignore_index = 9          # hard-coded in the reference module
        self.img_H = input_size[0] // downsample
        self.img_W = input_size[1] // downsample
        self.x_bound = [grid_config['x'][0] // grid_size[0], (grid_config['x'][1] + 0.1) // grid_size[0]]
        self.y_bound = [grid_config['y'][0] // grid_size[1], (grid_config['y'][1] + 0.1) // grid_size[1]]
        self.z_bound = [grid_config['z'][0] // grid_size[2], (grid_config['z'][1] + 0.1) // grid_size[2]]
        self.depth_bound = grid_config['depth']
        self.grid_ratio = (1.0 / grid_size[0], 1.0 / grid_size[1], 1.0 / grid_size[2])
        self.xyz_min = (float(self.x_bound[0]), float(self.y_bound[0]), float(self.z_bound[0]))
        self.xyz_max = (float(self.x_bound[1]), float(self.y_bound[1]), float(self.z_bound[1]))
        self.D = int(np.arange(self.depth_bound[0], self.depth_bound[1],
                               self.depth_bound[2]).shape[0])

    # ------------------------------------------------------------------
    def _semi_supervisor(self, occ_score):
        # TODO(synk): SemiSupervisor is built from an external MODELS registry config
        # (unspecified); stand-in confidence-thresholded self-training loss in plain JAX.
        probs = jax.nn.softmax(occ_score, axis=-1)
        conf = jnp.max(probs, axis=-1)
        labels = jnp.argmax(probs, axis=-1)
        mask = conf > 0.5
        nll = -jnp.log(conf + 1e-12)
        loss = jnp.sum(jnp.where(mask, nll, 0.0)) / jnp.maximum(jnp.sum(mask), 1)
        return mask, labels, loss

    # ------------------------------------------------------------------
    def __call__(self, cam_params, sem_OCC_map, sem_view_map, occ_score):
        cam2ego_rot, cam2ego_trans, cam2img, post_rots, post_trans, _bda = cam_params
        B, N = self.batch_size, self.num_cams
        H, W, D = self.img_H, self.img_W, self.D
        HW = H * W
        _, X, Y, Z, C = sem_OCC_map.shape
        n_render = 5                       # the reference hard-codes `for i in range(5)`
        assert N >= n_render
        ignore = self.ignore_index
        f32 = jnp.float32

        # ---- sem_OCC_map.softmax(-1).argmax(-1)  (Pallas, lane-dense (C,V)) ----
        V = X * Y * Z
        tv = _pick_tile(V)
        occ_t = jnp.transpose(sem_OCC_map.reshape(B, V, C), (0, 2, 1)).astype(f32)
        sem_idx = pl.pallas_call(
            functools.partial(_argmax_kernel, num_c=C),
            out_shape=jax.ShapeDtypeStruct((B, 1, V), jnp.int32),
            grid=(B, V // tv),
            in_specs=[pl.BlockSpec((1, C, tv), lambda b, jv: (b, 0, jv))],
            out_specs=pl.BlockSpec((1, 1, tv), lambda b, jv: (b, 0, jv)),
            compiler_params=pltpu.CompilerParams(
                dimension_semantics=("parallel", "parallel")),
        )(occ_t)
        sem_map_flat = sem_idx.reshape(B, V)                       # (B, X*Y*Z) int32

        # ---- precompose camera math (tiny 3x3s, plain JAX glue) ----
        ds = float(self.downsample)
        rot5 = cam2ego_rot[:, :n_render].astype(f32)
        trn5 = cam2ego_trans[:, :n_render].astype(f32)
        k5 = cam2img[:, :n_render].astype(f32)
        pr5 = post_rots[:, :n_render].astype(f32)
        pt5 = post_trans[:, :n_render].astype(f32)

        post_rot_inv = jnp.linalg.inv(pr5)                         # (B,5,3,3)
        img2cam = jnp.linalg.inv(k5)                               # (B,5,3,3)
        A = post_rot_inv * jnp.array([ds, ds, 1.0], f32)           # columns scaled by ds
        t1 = jnp.einsum('bnij,bnj->bni', post_rot_inv, pt5)
        a0 = A[..., 0]
        a1 = A[..., 1]
        b1 = A[..., 2] - t1
        ratio = jnp.array(self.grid_ratio, f32)
        M2 = ratio[:, None] * jnp.einsum('bnij,bnjk->bnik', rot5, img2cam)
        t2 = ratio * trn5 - jnp.array(self.xyz_min, f32)
        cams = jnp.concatenate(
            [a0, a1, b1, M2.reshape(B, n_render, 9), t2], axis=-1).reshape(-1)  # (B*5*21,)

        # ---- frustum -> linear voxel index (-1 == out of grid)  (Pallas) ----
        thw = _pick_tile(HW)
        ext = (self.xyz_max[0] - self.xyz_min[0],
               self.xyz_max[1] - self.xyz_min[1],
               self.xyz_max[2] - self.xyz_min[2])
        lin_idx = pl.pallas_call(
            functools.partial(_frustum_kernel, num_views=n_render, tile_hw=thw,
                              img_w=W, d_start=float(self.depth_bound[0]),
                              d_step=float(self.depth_bound[2]),
                              ext=ext, dims=(X, Y, Z)),
            out_shape=jax.ShapeDtypeStruct((B, n_render, D, HW), jnp.int32),
            grid=(B, n_render, HW // thw),
            in_specs=[pl.BlockSpec(memory_space=pltpu.MemorySpace.SMEM)],
            out_specs=pl.BlockSpec((1, 1, D, thw), lambda b, n, j: (b, n, 0, j)),
            compiler_params=pltpu.CompilerParams(
                dimension_semantics=("parallel", "parallel", "parallel")),
        )(cams)

        # ---- map_coords_to_semantics: data-dependent 3-D volume gather ----
        # TODO(synk): arbitrary-index gather kept in XLA glue (no clean Pallas TPU
        # primitive for per-lane table gather); -1 sentinel selects the ignore class.
        safe = jnp.maximum(lin_idx, 0)
        raw = sem_map_flat[jnp.arange(B)[:, None, None, None], safe]   # (B,5,D,HW)
        raw = jnp.where(lin_idx >= 0, raw, ignore).astype(jnp.int32)

        # ---- first-non-ignore along depth + pseudo depth map (Pallas) ----
        render_sem, render_depth = pl.pallas_call(
            functools.partial(_render_kernel, d_start=float(self.depth_bound[0]),
                              d_step=float(self.depth_bound[2]), ignore=ignore),
            out_shape=(jax.ShapeDtypeStruct((B, n_render, 1, HW), jnp.int32),
                       jax.ShapeDtypeStruct((B, n_render, 1, HW), jnp.float32)),
            grid=(B, n_render, HW // thw),
            in_specs=[pl.BlockSpec((1, 1, D, thw), lambda b, n, j: (b, n, 0, j))],
            out_specs=(pl.BlockSpec((1, 1, 1, thw), lambda b, n, j: (b, n, 0, j)),
                       pl.BlockSpec((1, 1, 1, thw), lambda b, n, j: (b, n, 0, j))),
            compiler_params=pltpu.CompilerParams(
                dimension_semantics=("parallel", "parallel", "parallel")),
        )(raw)
        render_sem_map = render_sem.reshape(B, n_render, H, W)
        render_depth_map = render_depth.reshape(B, n_render, H, W)

        # ---- SemiSupervisor (placeholder, plain JAX) ----
        _pseudo_mask, _conf_labels, loss_pseudo = self._semi_supervisor(occ_score)

        # ---- semantic_loss_with_mask: CE(one_hot(pred), render, ignore) (Pallas) ----
        T = B * n_render * H * W
        T_pad = ((T + 1023) // 1024) * 1024
        pred = sem_view_map.reshape(-1).astype(jnp.int32)
        tgt = render_sem_map.reshape(-1).astype(jnp.int32)
        if T_pad != T:
            pred = jnp.pad(pred, (0, T_pad - T))
            tgt = jnp.pad(tgt, (0, T_pad - T), constant_values=ignore)
        R = T_pad // 128
        loss_sem_pseudo = pl.pallas_call(
            functools.partial(_ce_kernel, num_class=self.num_class, ignore=ignore),
            out_shape=jax.ShapeDtypeStruct((1, 1), jnp.float32),
            grid=(1,),
            in_specs=[pl.BlockSpec((R, 128), lambda i: (0, 0)),
                      pl.BlockSpec((R, 128), lambda i: (0, 0))],
            out_specs=pl.BlockSpec((1, 1), lambda i: (0, 0)),
        )(pred.reshape(R, 128), tgt.reshape(R, 128))[0, 0]

        loss_all = 0.05 * loss_sem_pseudo + 0.2 * loss_pseudo
        return render_sem_map, render_depth_map, loss_all


# ----------------------------------------------------------------------------
if __name__ == "__main__":
    key = jax.random.PRNGKey(0)
    B, N = 2, 5
    num_class = 10
    grid_config = {'x': [-2.0, 2.0, 0.4], 'y': [-2.0, 2.0, 0.4],
                   'z': [-1.0, 1.0, 0.4], 'depth': [1.0, 5.0, 0.5]}
    input_size = (16, 16)

    net = PesudoRenderNetPallas(num_cams=N, batch_size=B, downsample=1,
                                grid_config=grid_config, input_size=input_size,
                                grid_size=[0.4, 0.4, 0.4], num_class=num_class)

    X = int(net.x_bound[1] - net.x_bound[0])   # 10
    Y = int(net.y_bound[1] - net.y_bound[0])   # 10
    Z = int(net.z_bound[1] - net.z_bound[0])   # 5
    C = num_class

    k1, k2, k3 = jax.random.split(key, 3)
    sem_OCC_map = jax.random.normal(k1, (B, X, Y, Z, C), jnp.float32)
    sem_view_map = jax.random.randint(k2, (B, 5, net.img_H, net.img_W), 0, C, dtype=jnp.int32)
    occ_score = jax.random.normal(k3, (B, X, Y, Z, C), jnp.float32)

    # deterministic camera parameters
    f, cx, cy = 8.0, net.img_W / 2.0, net.img_H / 2.0
    cam2img = jnp.broadcast_to(
        jnp.array([[f, 0.0, cx], [0.0, f, cy], [0.0, 0.0, 1.0]], jnp.float32), (B, N, 3, 3))
    post_rots = jnp.broadcast_to(jnp.eye(3, dtype=jnp.float32), (B, N, 3, 3))
    post_trans = jnp.zeros((B, N, 3), jnp.float32)

    base_r = np.array([[0.0, 0.0, 1.0], [-1.0, 0.0, 0.0], [0.0, -1.0, 0.0]])  # cam -> ego
    yaws = np.linspace(0.0, 2.0 * np.pi, N, endpoint=False)
    rz = np.stack([np.array([[np.cos(t), -np.sin(t), 0.0],
                             [np.sin(t), np.cos(t), 0.0],
                             [0.0, 0.0, 1.0]]) for t in yaws])
    cam2ego_rot = jnp.asarray(np.broadcast_to(rz @ base_r, (B, N, 3, 3)), jnp.float32)
    cam2ego_trans = jnp.broadcast_to(jnp.array([0.0, 0.0, -0.5], jnp.float32), (B, N, 3))
    bda = jnp.broadcast_to(jnp.eye(3, dtype=jnp.float32), (B, 3, 3))
    cam_params = (cam2ego_rot, cam2ego_trans, cam2img, post_rots, post_trans, bda)

    render_sem_map, render_depth_map, loss_all = net(cam_params, sem_OCC_map,
                                                     sem_view_map, occ_score)
    jax.block_until_ready((render_sem_map, render_depth_map, loss_all))
    assert render_sem_map.shape == (B, 5, net.img_H, net.img_W)
    assert render_depth_map.shape == (B, 5, net.img_H, net.img_W)
    assert jnp.isfinite(loss_all)
    print("KERNEL_OK")
</pallas_src>

<mosaic_0001>
module attributes {stable_mosaic.version = 11 : i64} {
  func.func @_argmax_kernel(%arg0: i32, %arg1: i32, %arg2: memref<1x10x500xf32, #tpu.memory_space<vmem>>, %arg3: memref<1x1x500xi32, #tpu.memory_space<vmem>>) attributes {dimension_semantics = [#tpu.dimension_semantics<parallel>, #tpu.dimension_semantics<parallel>], iteration_bounds = array<i64: 2, 1>, scalar_prefetch = 0 : i64, scratch_operands = 0 : i64, tpu.core_type = #tpu.core_type<tc>, window_params = [{transform_indices = @transform_0, window_bounds = array<i64: 1, 10, 500>}, {transform_indices = @transform_1, window_bounds = array<i64: 1, 1, 500>}]} {
    %c0 = arith.constant 0 : index
    %c0_0 = arith.constant 0 : index
    %c0_1 = arith.constant 0 : index
    %0 = vector.load %arg2[%c0, %c0_0, %c0_1] : memref<1x10x500xf32, #tpu.memory_space<vmem>>, vector<1x10x500xf32>
    %1 = vector.shape_cast %0 : vector<1x10x500xf32> to vector<10x500xf32>
    %cst = arith.constant dense<0xFF800000> : vector<500xf32>
    %2 = vector.multi_reduction <maximumf>, %1, %cst [0] : vector<10x500xf32> to vector<500xf32>
    %3 = vector.shape_cast %2 : vector<500xf32> to vector<1x500xf32>
    %4 = tpu.iota {dimensions = array<i32: 0>} : vector<10x500xi32>
    %5 = vector.broadcast %3 : vector<1x500xf32> to vector<10x500xf32>
    %6 = arith.cmpf oeq, %1, %5 : vector<10x500xf32>
    %c10_i32 = arith.constant 10 : i32
    %7 = vector.broadcast %c10_i32 : i32 to vector<10x500xi32>
    %8 = arith.select %6, %4, %7 : vector<10x500xi1>, vector<10x500xi32>
    %cst_2 = arith.constant dense<2147483647> : vector<500xi32>
    %9 = vector.multi_reduction <minsi>, %8, %cst_2 [0] : vector<10x500xi32> to vector<500xi32>
    %10 = vector.shape_cast %9 : vector<500xi32> to vector<1x500xi32>
    %c0_3 = arith.constant 0 : index
    %c0_4 = arith.constant 0 : index
    %c0_5 = arith.constant 0 : index
    %11 = vector.load %arg3[%c0_3, %c0_4, %c0_5] : memref<1x1x500xi32, #tpu.memory_space<vmem>>, vector<1x1x500xi32>
    %12 = vector.shape_cast %11 : vector<1x1x500xi32> to vector<1x500xi32>
    %13 = vector.shape_cast %10 : vector<1x500xi32> to vector<1x1x500xi32>
    tpu.vector_store %arg3[%c0_3, %c0_4, %c0_5], %13 {strides = array<i32>} : memref<1x1x500xi32, #tpu.memory_space<vmem>>, vector<1x1x500xi32>,
    return
  }
  func.func @transform_0(%arg0: i32, %arg1: i32) -> (i32, i32, i32) {
    %c0_i32 = arith.constant 0 : i32
    %c0_i32_0 = arith.constant 0 : i32
    return %arg0, %c0_i32, %arg1 : i32, i32, i32
  }
  func.func @transform_1(%arg0: i32, %arg1: i32) -> (i32, i32, i32) {
    %c0_i32 = arith.constant 0 : i32
    %c0_i32_0 = arith.constant 0 : i32
    return %arg0, %c0_i32, %arg1 : i32, i32, i32
  }
}

</mosaic_0001>

<bundles_post_ra>
// kernel: tpu_custom_call.1
= control target key start
LH: loop header
LB: loop body
LE: loop exit
PB: predicated region body
PF: predicated region fallthrough
CT: control target
= control target key end

     0   :  { %6 = vsyncpa [#allocation3], 0  ;;  %s679_s0 = inlined_call_operand.vmem [shape: f32[2,10,500], index: 0, kind: input, shape index: {}]   ;;  %s680_s1 = inlined_call_operand.hbm [shape: s32[2,1,500], index: 1, kind: output, shape index: {}]  }
   0x1   :  { %8 = vsyncpa [#allocation3 + $0x1], 0  ;;  %s543_s6 = smov 0   ;;  %s545_s7 = smov 0  }
   0x2   :  { %s547_s8 = smov 0   ;;  %s549_s9 = smov 0  }
   0x3   :  { %s551_s10 = smov 0   ;;  %s553_s11 = smov 0  }
   0x4 LB: > { %s380_s12 = sadd.s32 4294967295, %s529_s11   ;;  %s381_s13 = sadd.s32 4294967294, %s529_s11   ;;  %s529_s11 = sphi %s553_s11, %s14_s11   ;;  %s525_s10 = sphi %s551_s10, %s687_s10   ;;  %s521_s9 = sphi %s549_s9, %s686_s9   ;;  %s517_s8 = sphi %s547_s8, %s685_s8   ;;  %s513_s7 = sphi %s545_s7, %s684_s7   ;;  %s509_s6 = sphi %s543_s6, %s683_s6  }
   0x5   : > { %s26_s14 = sadd.s32 1, %s525_s10  ;;  %s63_s15 = sadd.s32 1, %s517_s8 }
   0x6   : > { %p28_p0 = scmp.ge.s32.totalorder %s26_s14, 2  ;;  %p73_p1 = scmp.ne.s32.totalorder %s517_s8, %s513_s7 }
   0x7   : > { %p74_p2 = scmp.eq.s32.totalorder %s380_s12, 1  ;;  %p79_p3 = scmp.ne.s32.totalorder %s513_s7, %s509_s6 }
   0x8   : > { %s689_s14 = smov (%p28_p0, %s26_s14), 0  ;;  %p80_p5 = scmp.eq.s32.totalorder %s381_s13, 1 }
   0x9   : > { %p583_p4 = por %p74_p2, %p73_p1  ;;  %s58_s17 = ssub.s32 %s525_s10, %s689_s14 }
   0xa   : > { %p384_p6 = scmp.ge.s32.totalorder %s529_s11, 1  ;;  %p61_p7 = scmp.eq.s32.totalorder %s58_s17, 0 }
   0xb   : > { %p590_p8 = por %p80_p5, %p79_p3  ;;  %p111_p9 = scmp.lt.s32.totalorder %s529_s11, 3 }
   0xc   : > { %s596_s19 = scalar_select %p61_p7, %s517_s8, %s63_s15  }
   0xd   : > { %p112_p10 = pnand %p384_p6, %p111_p9 }
   0xe   : > { %p136_p11 = scmp.lt.s32.totalorder (!%p112_p10), %s521_s9, 1  ;;  %vm154_vm0 = vcmask (!%p112_p10), 1041408   ;;  %vm179_vm1 = vcmask (!%p112_p10), 949248   ;;  %vm181_vm2 = vcmask (!%p112_p10), 943104   ;;  %v190_v24 = vlaneseq (!%p112_p10)  ;;  %s132_s25 = sand.u32 (!%p112_p10), 1, %s513_s7  }
   0xf   : > { %115 = sbr.rel (%p112_p10) target bundleno = 86 (0x56), region = 24  ;;  %s385_s26 = sshll.u32 (!%p112_p10), %s132_s25, 2 }
  0x10   : > { %v609_v33 = vshrl.u32 (!%p112_p10), %v190_v24, 7  ;;  %s394_s27 = sshll.u32 (!%p112_p10), %s521_s9, 6  ;;  %s134_s28 = scalar_lea.vmem (!%p112_p10), [#allocation2], %s385_s26 }
  0x11   : > { %s304_s29 = sshll.u32 (!%p112_p10), %s134_s28, 4  ;;  %s630_s3 = scalar_lea.hbm (!%p112_p10), %s680_s1, %s394_s27  ;;  %s632_s29 = int_to_ptr.vmem [resolvable:$true] %s304_s29 }
  0x12   : > { %v192_v42 = vadd.s32 (!%p112_p10), 8, %v609_v33  ;;  %s288_s4 = scalar_lea.sflag (!%p112_p10), [#allocation3], %s132_s25  ;;  %s451_s5 = scalar_lea.vmem (!%p112_p10), %s632_s29, 64 }
  0x13   : > { %p452_p12 = scmp.ne.s32.totalorder (!%p112_p10), %s632_s29, %s451_s5 }
  0x15   : > { %p453_p13 = pnand (!%p112_p10), %p452_p12, %p583_p4 }
  0x16   : > { %s137_s20 = scalar_select %p136_p11, %s521_s9, 1 }
  0x17   : > { %p454_p0 = pneg %p453_p13  ;;  %s532_s9 = smov [#allocation2]  }
  0x18   : > { %s393_s21 = sshll.u32 %s137_s20, 6  ;;  %s455_s12 = sshll.u32 %s532_s9, 4  ;;  %s456_s12 = int_to_ptr.vmem [resolvable:$false] %s455_s12 }
  0x19   : > { %s143_s24 = scalar_lea.vmem %s679_s0, %s393_s21  ;;  %s457_s13 = scalar_lea.vmem %s456_s12, 128 }
  0x1a   : > { %v146_v0 = vld [vmem:[%s143_s24] sm:$0xff]  ;;  %v147_v1 = vld [vmem:[%s143_s24 + $0x8] sm:$0xff]  ;;  %v148_v2 = vld [vmem:[%s143_s24 + $0x10] sm:$0xff]  ;;  %p458_p1 = scmp.lt.s32.totalorder %s632_s29, %s456_s12  ;;  %p459_p2 = scmp.lt.s32.totalorder %s457_s13, %s451_s5 }
  0x1b   : > { %v149_v3 = vld [vmem:[%s143_s24 + $0x18] sm:$0xff]  ;;  %v150_v4 = vld [vmem:[%s143_s24 + $0x20] sm:$0x3]  ;;  %v151_v5 = vld [vmem:[%s143_s24 + $0x28] sm:$0x3] }
  0x1c   : > { %v152_v6 = vld [vmem:[%s143_s24 + $0x30] sm:$0x3]  ;;  %v153_v7 = vld [vmem:[%s143_s24 + $0x38] sm:$0x3]  ;;  %v155_v8 = vsel %vm154_vm0, %v150_v4, -inf  ;;  %v163_v9 = vsel %vm154_vm0, %v151_v5, -inf  ;;  %p460_p3 = por %p459_p2, %p458_p1 }
  0x1d   : > { %v156_v10 = vmax.f32 %v146_v0, %v155_v8  ;;  %v164_v11 = vmax.f32 %v147_v1, %v163_v9  ;;  %v171_v12 = vsel %vm154_vm0, %v152_v6, -inf  ;;  %v180_v13 = vsel %vm179_vm1, %v149_v3, -inf }
  0x1e   : > { %v172_v14 = vmax.f32 %v148_v2, %v171_v12  ;;  %v182_v15 = vsel %vm181_vm2, %v153_v7, -inf  ;;  %p461_p5 = pnand %p460_p3, %p454_p0 }
  0x1f   : > { %v157_v16 = vrot.slane %v156_v10, 4  ;;  %v165_v17 = vrot.slane %v164_v11, 4  ;;  %v183_v18 = vmax.f32 %v180_v13, %v182_v15 }
  0x20   : > { %v173_v19 = vrot.slane %v172_v14, 4 }
  0x21   : > { %v158_v20 = vmax.f32 %v156_v10, %v157_v16  ;;  %v166_v21 = vmax.f32 %v164_v11, %v165_v17  ;;  %v184_v22 = vrot.slane %v183_v18, 4 }
  0x22   : > { %v174_v23 = vmax.f32 %v172_v14, %v173_v19 }
  0x23   : > { %v159_v25 = vrot.slane %v158_v20, 2  ;;  %v167_v26 = vrot.slane %v166_v21, 2  ;;  %v185_v27 = vmax.f32 %v183_v18, %v184_v22 }
  0x24   : > { %v175_v28 = vrot.slane %v174_v23, 2 }
  0x25   : > { %v160_v29 = vmax.f32 %v158_v20, %v159_v25  ;;  %v168_v30 = vmax.f32 %v166_v21, %v167_v26  ;;  %v186_v31 = vrot.slane %v185_v27, 2 }
  0x26   : > { %v176_v32 = vmax.f32 %v174_v23, %v175_v28 }
  0x27   : > { %v161_v34 = vrot.slane %v160_v29, 1  ;;  %v169_v35 = vrot.slane %v168_v30, 1  ;;  %v187_v36 = vmax.f32 %v185_v27, %v186_v31 }
  0x28   : > { %v177_v37 = vrot.slane %v176_v32, 1 }
  0x29   : > { %v162_v38 = vmax.f32 %v160_v29, %v161_v34  ;;  %v170_v39 = vmax.f32 %v168_v30, %v169_v35  ;;  %v188_v40 = vrot.slane %v187_v36, 1 }
  0x2a   : > { %v178_v41 = vmax.f32 %v176_v32, %v177_v37 }
  0x2b   : > { %v189_v43 = vmax.f32 %v187_v36, %v188_v40  ;;  %vm193_vm3 = vcmp.eq.f32.partialorder %v146_v0, %v162_v38  ;;  %vm194_vm4 = vcmp.eq.f32.partialorder %v147_v1, %v170_v39  ;;  %vm197_vm5 = vcmp.eq.f32.partialorder %v150_v4, %v162_v38 }
  0x2c   : > { %vm195_vm6 = vcmp.eq.f32.partialorder %v148_v2, %v178_v41  ;;  %vm198_vm7 = vcmp.eq.f32.partialorder %v151_v5, %v170_v39  ;;  %vm199_vm8 = vcmp.eq.f32.partialorder %v152_v6, %v178_v41  ;;  %v201_v44 = vsel %vm193_vm3, %v609_v33, 10 }
  0x2d   : > { %vm196_vm9 = vcmp.eq.f32.partialorder %v149_v3, %v189_v43  ;;  %vm200_vm10 = vcmp.eq.f32.partialorder %v153_v7, %v189_v43  ;;  %v202_v45 = vsel %vm194_vm4, %v609_v33, 10  ;;  %v203_v46 = vsel %vm195_vm6, %v609_v33, 10 }
  0x2e   : > { %v204_v47 = vsel %vm196_vm9, %v609_v33, 10  ;;  %v205_v48 = vsel %vm197_vm5, %v192_v42, 10  ;;  %v206_v49 = vsel %vm198_vm7, %v192_v42, 10  ;;  %v207_v50 = vsel %vm199_vm8, %v192_v42, 10 }
  0x2f   : > { %v208_v51 = vsel %vm200_vm10, %v192_v42, 10  ;;  %v209_v52 = vsel %vm154_vm0, %v205_v48, 2147483647  ;;  %v221_v53 = vsel %vm154_vm0, %v206_v49, 2147483647 }
  0x30   : > { %vm210_vm11 = vcmp.lt.s32.totalorder %v201_v44, %v209_v52  ;;  %vm222_vm12 = vcmp.lt.s32.totalorder %v202_v45, %v221_v53  ;;  %v233_v54 = vsel %vm154_vm0, %v207_v50, 2147483647  ;;  %v245_v55 = vsel %vm179_vm1, %v204_v47, 2147483647 }
  0x31   : > { %v211_v56 = vsel %vm210_vm11, %v201_v44, %v209_v52  ;;  %v223_v57 = vsel %vm222_vm12, %v202_v45, %v221_v53  ;;  %vm234_vm13 = vcmp.lt.s32.totalorder %v203_v46, %v233_v54  ;;  %v246_v58 = vsel %vm181_vm2, %v208_v51, 2147483647 }
  0x32   : > { %v212_v59 = vrot.slane %v211_v56, 4  ;;  %v224_v60 = vrot.slane %v223_v57, 4  ;;  %v235_v61 = vsel %vm234_vm13, %v203_v46, %v233_v54  ;;  %vm247_vm14 = vcmp.lt.s32.totalorder %v245_v55, %v246_v58 }
  0x33   : > { %v236_v62 = vrot.slane %v235_v61, 4  ;;  %v248_v63 = vsel %vm247_vm14, %v245_v55, %v246_v58  ;;  %v531_v1 = vmov 1966171168   ;;  %vm284_vm11 = vcmp.lt.s32.totalorder %v190_v24, 500 }
  0x34   : > { %vm213_vm15 = vcmp.lt.s32.totalorder %v211_v56, %v212_v59  ;;  %vm225_vm3 = vcmp.lt.s32.totalorder %v223_v57, %v224_v60  ;;  %v249_v0 = vrot.slane %v248_v63, 4  ;;  %v261_v2 = vunpack.c.l.s4 %v531_v1 }
  0x35   : > { %v214_v3 = vsel %vm213_vm15, %v211_v56, %v212_v59  ;;  %v226_v4 = vsel %vm225_vm3, %v223_v57, %v224_v60  ;;  %vm237_vm0 = vcmp.lt.s32.totalorder %v235_v61, %v236_v62 }
  0x36   : > { %v215_v5 = vrot.slane %v214_v3, 2  ;;  %v227_v6 = vrot.slane %v226_v4, 2  ;;  %v238_v7 = vsel %vm237_vm0, %v235_v61, %v236_v62  ;;  %vm250_vm1 = vcmp.lt.s32.totalorder %v248_v63, %v249_v0 }
  0x37   : > { %v239_v8 = vrot.slane %v238_v7, 2  ;;  %v251_v9 = vsel %vm250_vm1, %v248_v63, %v249_v0  ;;  %v262_v11 = vunpack.c.0.s8 %v261_v2 }
  0x38   : > { %vm216_vm2 = vcmp.lt.s32.totalorder %v214_v3, %v215_v5  ;;  %vm228_vm4 = vcmp.lt.s32.totalorder %v226_v4, %v227_v6  ;;  %v252_v10 = vrot.slane %v251_v9, 2 }
  0x39   : > { %v217_v12 = vsel %vm216_vm2, %v214_v3, %v215_v5  ;;  %v229_v13 = vsel %vm228_vm4, %v226_v4, %v227_v6  ;;  %vm240_vm5 = vcmp.lt.s32.totalorder %v238_v7, %v239_v8  ;;  %v265_v20 = vsub.s32 %v262_v11, %v609_v33 }
  0x3a   : > { %v218_v14 = vrot.slane %v217_v12, 1  ;;  %v230_v15 = vrot.slane %v229_v13, 1  ;;  %v241_v16 = vsel %vm240_vm5, %v238_v7, %v239_v8  ;;  %vm253_vm6 = vcmp.lt.s32.totalorder %v251_v9, %v252_v10 }
  0x3b   : > { %v242_v17 = vrot.slane %v241_v16, 1  ;;  %v254_v18 = vsel %vm253_vm6, %v251_v9, %v252_v10 }
  0x3c   : > { %vm219_vm7 = vcmp.lt.s32.totalorder %v217_v12, %v218_v14  ;;  %vm231_vm8 = vcmp.lt.s32.totalorder %v229_v13, %v230_v15  ;;  %v255_v19 = vrot.slane %v254_v18, 1 }
  0x3d   : > { %v220_v21 = vsel %vm219_vm7, %v217_v12, %v218_v14  ;;  %v232_v22 = vsel %vm231_vm8, %v229_v13, %v230_v15  ;;  %vm243_vm9 = vcmp.lt.s32.totalorder %v241_v16, %v242_v17 }
  0x3e   : > { %v244_v23 = vsel %vm243_vm9, %v241_v16, %v242_v17  ;;  %vm256_vm10 = vcmp.lt.s32.totalorder %v254_v18, %v255_v19  ;;  %v258_v25 = vcombine.low %v220_v21, %v232_v22 }
  0x3f   : > { %v257_v26 = vsel %vm256_vm10, %v254_v18, %v255_v19 }
  0x40   : > { %v259_v27 = vcombine.low %v244_v23, %v257_v26  ;;  %v266_v28 = vrot.slane %v258_v25, %v265_v20 }
  0x42   : > { %v273_v29 = vrot.slane %v259_v27, %v265_v20 }
  0x44   : > { %v274_v30 = vcombine.low %v266_v28, %v273_v29 }
  0x46   : > { %v281_v31 = vrot.slane %v274_v30, %v265_v20 }
  0x48   : > { %286 = vst.msk [vmem:[%s134_s28] sm:$0xf] %vm284_vm11, %v281_v31 }
  0x49   : > { %464 = shalt.err (!%p461_p5)
}
  0x4a   : > { %s465_s15 = scalar_lea.hbm %s630_s3, 64  ;;  %s469_s21 = scalar_lea.hbm %s680_s1, 128 }
  0x4b   : > { %p466_p6 = scmp.ne.s32.totalorder %s630_s3, %s465_s15  ;;  %p470_p10 = scmp.lt.u32.totalorder %s630_s3, %s680_s1 }
  0x4c   : > { %p471_p11 = scmp.lt.u32.totalorder %s469_s21, %s465_s15  ;;  %p473_p13 = scmp.lt.u32.totalorder %s465_s15, %s630_s3 }
  0x4d   : > { %p467_p7 = pnand %p466_p6, %p583_p4 }
  0x4e   : > { %p472_p12 = por %p471_p11, %p470_p10 }
  0x4f   : > { %p468_p9 = pneg %p467_p7 }
  0x50   : > { %p474_p0 = por %p473_p13, %p472_p12 }
  0x52   : > { %p475_p1 = pnand %p474_p0, %p468_p9 }
  0x54   : > { %478 = shalt.err (!%p475_p1)
}
  0x55   : > { %395 = dma.vmem_to_hbm [thread:$0]  (%p583_p4), %s632_s29, 64, %s630_s3, %s288_s4  }
  0x56 PF: > { %p401_p2 = scmp.ge.s32.totalorder %s529_s11, 2  ;;  %s316_s24 = sand.u32 1, %s509_s6  }
  0x57   : > { %s317_s25 = scalar_lea.sflag [#allocation3], %s316_s24 }
  0x58   : > { %p398_p3 = pnand %p401_p2, %p590_p8 }
  0x5a   : > { %504 = dma.done.wait (!%p398_p3), %s317_s25, 64  }
  0x5b   : > { %506 = vsyncadd (!%p398_p3), %s317_s25, 4294967232  ;;  %s14_s11 = sadd.s32 1, %s529_s11   ;;  %s683_s6 = smov %s513_s7 }
  0x5c   : > { %p11_p5 = scmp.ge.s32.totalorder %s14_s11, 4   ;;  %s684_s7 = smov %s517_s8 }
  0x5d   : > { %s685_s8 = smov %s596_s19  ;;  %s686_s9 = smov %s525_s10 }
  0x5e   : > { %s687_s10 = smov %s689_s14  ;;  %13 = sbr.rel (!%p11_p5) target bundleno = 4 (0x4), region = 59 }
  0x65   :  { %322 = vsyncpa [#allocation3], 1 }
  0x66   :  { %324 = vsyncpa [#allocation3 + $0x1], 1 }

</bundles_post_ra>
